<compile_context>
chip_gen: v7x
topology: tpu7x:2x2x1
jax: 0.10.0
libtpu: 0.0.40
codegen_flags: <defaults>
</compile_context>

<pallas_src>
import jax
import jax.numpy as jnp
from jax.experimental import pallas as pl
from jax.experimental.pallas import tpu as pltpu


def _round_up(x, m):
    return ((x + m - 1) // m) * m


def _pick_batch_tile(b_pad, tb_max):
    """Largest multiple-of-8 divisor of b_pad that (a) stays <= tb_max and
    (b) keeps the grid at >= 2 steps when possible, so the 'parallel' batch
    axis actually splits across v7x's two TensorCores."""
    target = min(tb_max, b_pad)
    if b_pad >= 16:
        target = min(target, b_pad // 2)   # guarantee >= 2 grid steps
    q = b_pad // 8
    best = 8
    d = 1
    while d * d <= q:
        if q % d == 0:
            for dd in (d, q // d):
                tb = 8 * dd
                if best < tb <= target:
                    best = tb
        d += 1
    return best


def _softmax_f32(logits):
    """Numerically-stable softmax, strictly f32 (v5e has no bf16 VPU/EUP)."""
    m = jnp.max(logits, axis=-1, keepdims=True)
    e = jnp.exp(logits - m)
    denom = jnp.sum(e, axis=-1, keepdims=True)
    # EUP approx reciprocal + one Newton step: ~1e-6 rel err, no VALU divide.
    r = pl.reciprocal(denom, approx=True)
    r = r * (2.0 - denom * r)
    return e * r


def _policy_kernel(x_ref, w_ref, b_ref, logits_ref, probs_ref):
    logits = jnp.dot(x_ref[...], w_ref[...],
                     preferred_element_type=jnp.float32) + b_ref[...]
    probs_ref[...] = _softmax_f32(logits).astype(probs_ref.dtype)
    logits_ref[...] = logits.astype(logits_ref.dtype)


def _policy_kernel_probs_only(x_ref, w_ref, b_ref, probs_ref):
    logits = jnp.dot(x_ref[...], w_ref[...],
                     preferred_element_type=jnp.float32) + b_ref[...]
    probs_ref[...] = _softmax_f32(logits).astype(probs_ref.dtype)


def pack_policy_params(weight, bias, *, compute_dtype=jnp.float32):
    """One-time packing of nn.Linear params.

    weight: [n_actions, obs_size] (PyTorch layout) -> w_t [obs_size, n_actions]
    bias:   [n_actions]                            -> b2  [1, n_actions] (f32)
    Hoist this out of the per-step RL loop: it launches the transpose/cast
    kernels once instead of on every forward call.
    """
    w_t = weight.T.astype(compute_dtype)
    b2 = bias.reshape(1, -1).astype(jnp.float32)
    return w_t, b2


def policy_net_forward_packed(state, w_t, b2, *,
                              out_dtype=jnp.float32,
                              tb_max=2048,
                              return_logits=True):
    """PolicyNet forward (Linear + Softmax) with pre-packed parameters.

    state: [B, obs_size]
    w_t:   [obs_size, n_actions]   (from pack_policy_params)
    b2:    [1, n_actions] float32  (from pack_policy_params)
    Returns (logits, probs) if return_logits else probs; each [B, n_actions].
    """
    B, K = state.shape
    K2, N = w_t.shape
    assert K == K2, "weight / state feature mismatch"

    # Pad the batch only to the 8-sublane granule (tiny copy, only if B%8 != 0).
    B_pad = _round_up(B, 8)
    x = state
    if x.dtype != w_t.dtype:      # only cast if an explicit compute dtype was packed
        x = x.astype(w_t.dtype)
    if B_pad != B:
        x = jnp.pad(x, ((0, B_pad - B), (0, 0)))

    TB = _pick_batch_tile(B_pad, tb_max)
    grid = (B_pad // TB,)

    # Per-step VMEM footprint (double-buffered in/out tiles + resident params).
    in_item = jnp.dtype(w_t.dtype).itemsize
    out_item = jnp.dtype(out_dtype).itemsize
    n_outs = 2 if return_logits else 1
    step_bytes = 2 * (TB * K * in_item + n_outs * TB * N * out_item) \
        + K * N * in_item + N * 4
    cp_kwargs = dict(dimension_semantics=("parallel",))
    if step_bytes > (14 << 20):   # headroom under v5e's 16 MiB scoped default
        cp_kwargs["vmem_limit_bytes"] = min(2 * step_bytes + (4 << 20), 60 << 20)
    compiler_params = pltpu.CompilerParams(**cp_kwargs)

    x_spec = pl.BlockSpec((TB, K), lambda i: (i, 0))    # batch tile (pipelined)
    w_spec = pl.BlockSpec((K, N), lambda i: (0, 0))     # VMEM-resident weight
    b_spec = pl.BlockSpec((1, N), lambda i: (0, 0))     # VMEM-resident bias
    o_spec = pl.BlockSpec((TB, N), lambda i: (i, 0))    # real-width (no lane pad)

    if return_logits:
        kernel = _policy_kernel
        out_shape = (jax.ShapeDtypeStruct((B_pad, N), out_dtype),
                     jax.ShapeDtypeStruct((B_pad, N), out_dtype))
        out_specs = [o_spec, o_spec]
    else:
        kernel = _policy_kernel_probs_only
        out_shape = (jax.ShapeDtypeStruct((B_pad, N), out_dtype),)
        out_specs = [o_spec]

    outs = pl.pallas_call(
        kernel,
        out_shape=out_shape,
        grid_spec=pltpu.PrefetchScalarGridSpec(
            num_scalar_prefetch=0,
            grid=grid,
            in_specs=[x_spec, w_spec, b_spec],
            out_specs=out_specs,
        ),
        compiler_params=compiler_params,
    )(x, w_t, b2)

    if return_logits:
        logits_p, probs_p = outs
        if B_pad != B:
            logits_p, probs_p = logits_p[:B], probs_p[:B]
        return logits_p, probs_p
    probs_p = outs[0]
    if B_pad != B:
        probs_p = probs_p[:B]
    return probs_p


def policy_net_forward(state, weight, bias, **kwargs):
    """Convenience wrapper: packs params per call (prefer pack_policy_params +
    policy_net_forward_packed inside an RL loop)."""
    w_t, b2 = pack_policy_params(weight, bias)
    return policy_net_forward_packed(state, w_t, b2, **kwargs)


if __name__ == "__main__":
    # Small shapes consistent with the module: batch=8, obs_size=32, n_actions=16
    B, obs_size, n_actions = 8, 32, 16

    key = jax.random.PRNGKey(0)
    k_x, k_w, k_b = jax.random.split(key, 3)

    # Deterministic parameter init mimicking nn.Linear (uniform +/- 1/sqrt(fan_in))
    bound = 1.0 / jnp.sqrt(jnp.float32(obs_size))
    weight = jax.random.uniform(k_w, (n_actions, obs_size), jnp.float32, -bound, bound)
    bias = jax.random.uniform(k_b, (n_actions,), jnp.float32, -bound, bound)
    state = jax.random.normal(k_x, (B, obs_size), jnp.float32)

    # One-time parameter packing (hoisted out of the per-call path).
    w_t, b2 = pack_policy_params(weight, bias)

    # ---- exact f32 path, tiny batch ----
    logits, probs = policy_net_forward_packed(state, w_t, b2)
    jax.block_until_ready((logits, probs))

    ref_logits = state @ weight.T + bias
    ref_probs = jax.nn.softmax(ref_logits, axis=-1)
    assert logits.shape == (B, n_actions) and probs.shape == (B, n_actions)
    assert jnp.allclose(logits, ref_logits, atol=1e-5, rtol=1e-5)
    assert jnp.allclose(probs, ref_probs, atol=1e-5, rtol=1e-5)
    assert jnp.allclose(jnp.sum(probs, axis=-1), 1.0, atol=1e-5)

    # ---- larger batch: grid has >= 2 steps (v7x megacore split), f32 path ----
    B2 = 512
    state2 = jax.random.normal(jax.random.PRNGKey(1), (B2, obs_size), jnp.float32)
    logits2, probs2 = policy_net_forward_packed(state2, w_t, b2)
    jax.block_until_ready((logits2, probs2))
    ref_logits2 = state2 @ weight.T + bias
    ref_probs2 = jax.nn.softmax(ref_logits2, axis=-1)
    assert logits2.shape == (B2, n_actions) and probs2.shape == (B2, n_actions)
    assert jnp.allclose(logits2, ref_logits2, atol=1e-5, rtol=1e-5)
    assert jnp.allclose(probs2, ref_probs2, atol=1e-5, rtol=1e-5)

    # ---- probs-only inference path with bf16 output stream (half the bytes) ----
    probs3 = policy_net_forward_packed(state2, w_t, b2,
                                       return_logits=False,
                                       out_dtype=jnp.bfloat16)
    jax.block_until_ready(probs3)
    assert probs3.shape == (B2, n_actions)
    assert jnp.allclose(probs3.astype(jnp.float32), ref_probs2, atol=1e-2)

    print("KERNEL_OK")
</pallas_src>

<mosaic_0001>
module attributes {stable_mosaic.version = 11 : i64} {
  func.func @_policy_kernel(%arg0: i32, %arg1: memref<8x32xf32, #tpu.memory_space<vmem>>, %arg2: memref<32x16xf32, #tpu.memory_space<vmem>>, %arg3: memref<1x16xf32, #tpu.memory_space<vmem>>, %arg4: memref<8x16xf32, #tpu.memory_space<vmem>>, %arg5: memref<8x16xf32, #tpu.memory_space<vmem>>) attributes {dimension_semantics = [#tpu.dimension_semantics<parallel>], iteration_bounds = array<i64: 1>, scalar_prefetch = 0 : i64, scratch_operands = 0 : i64, tpu.core_type = #tpu.core_type<tc>, window_params = [{transform_indices = @transform_0, window_bounds = array<i64: 8, 32>}, {pipeline_mode = #tpu.pipeline_mode<synchronous>, transform_indices = @transform_1, window_bounds = array<i64: 32, 16>}, {pipeline_mode = #tpu.pipeline_mode<synchronous>, transform_indices = @transform_2, window_bounds = array<i64: 1, 16>}, {transform_indices = @transform_3, window_bounds = array<i64: 8, 16>}, {transform_indices = @transform_4, window_bounds = array<i64: 8, 16>}]} {
    %c0 = arith.constant 0 : index
    %c0_0 = arith.constant 0 : index
    %0 = vector.load %arg1[%c0, %c0_0] : memref<8x32xf32, #tpu.memory_space<vmem>>, vector<8x32xf32>
    %c0_1 = arith.constant 0 : index
    %c0_2 = arith.constant 0 : index
    %1 = vector.load %arg2[%c0_1, %c0_2] : memref<32x16xf32, #tpu.memory_space<vmem>>, vector<32x16xf32>
    %cst = arith.constant dense<0.000000e+00> : vector<8x16xf32>
    %2 = tpu.matmul %0, %1, %cst {dimension_numbers = #tpu.dot_dimension_numbers<[1], [0], [0], [1], [0, 0, 1, 1], [], []>} : vector<8x32xf32>, vector<32x16xf32>, vector<8x16xf32> -> vector<8x16xf32>
    %c0_3 = arith.constant 0 : index
    %c0_4 = arith.constant 0 : index
    %3 = vector.load %arg3[%c0_3, %c0_4] : memref<1x16xf32, #tpu.memory_space<vmem>>, vector<1x16xf32>
    %4 = vector.broadcast %3 : vector<1x16xf32> to vector<8x16xf32>
    %5 = arith.addf %2, %4 : vector<8x16xf32>
    %cst_5 = arith.constant dense<0xFF800000> : vector<8xf32>
    %6 = vector.multi_reduction <maximumf>, %5, %cst_5 [1] : vector<8x16xf32> to vector<8xf32>
    %7 = vector.shape_cast %6 : vector<8xf32> to vector<8x1xf32>
    %8 = vector.broadcast %7 : vector<8x1xf32> to vector<8x16xf32>
    %9 = arith.subf %5, %8 : vector<8x16xf32>
    %10 = math.exp %9 : vector<8x16xf32>
    %cst_6 = arith.constant dense<0.000000e+00> : vector<8xf32>
    %11 = vector.multi_reduction <add>, %10, %cst_6 [1] : vector<8x16xf32> to vector<8xf32>
    %12 = vector.shape_cast %11 : vector<8xf32> to vector<8x1xf32>
    %13 = tpu.reciprocal %12 {approx = true} : vector<8x1xf32> -> vector<8x1xf32>
    %14 = arith.mulf %12, %13 : vector<8x1xf32>
    %cst_7 = arith.constant 2.000000e+00 : f32
    %15 = vector.broadcast %cst_7 : f32 to vector<8x1xf32>
    %16 = arith.subf %15, %14 : vector<8x1xf32>
    %17 = arith.mulf %13, %16 : vector<8x1xf32>
    %18 = vector.broadcast %17 : vector<8x1xf32> to vector<8x16xf32>
    %19 = arith.mulf %10, %18 : vector<8x16xf32>
    %c0_8 = arith.constant 0 : index
    %c0_9 = arith.constant 0 : index
    %20 = vector.load %arg5[%c0_8, %c0_9] : memref<8x16xf32, #tpu.memory_space<vmem>>, vector<8x16xf32>
    tpu.vector_store %arg5[%c0_8, %c0_9], %19 {strides = array<i32>} : memref<8x16xf32, #tpu.memory_space<vmem>>, vector<8x16xf32>,
    %c0_10 = arith.constant 0 : index
    %c0_11 = arith.constant 0 : index
    %21 = vector.load %arg4[%c0_10, %c0_11] : memref<8x16xf32, #tpu.memory_space<vmem>>, vector<8x16xf32>
    tpu.vector_store %arg4[%c0_10, %c0_11], %5 {strides = array<i32>} : memref<8x16xf32, #tpu.memory_space<vmem>>, vector<8x16xf32>,
    return
  }
  func.func @transform_0(%arg0: i32) -> (i32, i32) {
    %c0_i32 = arith.constant 0 : i32
    %c0_i32_0 = arith.constant 0 : i32
    return %arg0, %c0_i32 : i32, i32
  }
  func.func @transform_1(%arg0: i32) -> (i32, i32) {
    %c0_i32 = arith.constant 0 : i32
    %c0_i32_0 = arith.constant 0 : i32
    %c0_i32_1 = arith.constant 0 : i32
    return %c0_i32, %c0_i32_0 : i32, i32
  }
  func.func @transform_2(%arg0: i32) -> (i32, i32) {
    %c0_i32 = arith.constant 0 : i32
    %c0_i32_0 = arith.constant 0 : i32
    %c0_i32_1 = arith.constant 0 : i32
    return %c0_i32, %c0_i32_0 : i32, i32
  }
  func.func @transform_3(%arg0: i32) -> (i32, i32) {
    %c0_i32 = arith.constant 0 : i32
    %c0_i32_0 = arith.constant 0 : i32
    return %arg0, %c0_i32 : i32, i32
  }
  func.func @transform_4(%arg0: i32) -> (i32, i32) {
    %c0_i32 = arith.constant 0 : i32
    %c0_i32_0 = arith.constant 0 : i32
    return %arg0, %c0_i32 : i32, i32
  }
}

</mosaic_0001>

<bundles_post_ra>
// kernel: tpu_custom_call.1
= control target key start
LH: loop header
LB: loop body
LE: loop exit
PB: predicated region body
PF: predicated region fallthrough
CT: control target
= control target key end

     0   :  { %10 = vsyncpa [#allocation3], 0  ;;  %v230_v3 = vmov 0.0|0.0   ;;  %vm231_vm0 = vmmov 0   ;;  %v232_v6 = vmov 0.0   ;;  %s306_s0 = inlined_call_operand.vmem [shape: f32[8,32], index: 0, kind: input, shape index: {}]   ;;  %s307_s1 = inlined_call_operand.vmem [shape: f32[32,16], index: 1, kind: input, shape index: {}]   ;;  %s308_s2 = inlined_call_operand.vmem [shape: f32[1,16], index: 2, kind: input, shape index: {}]   ;;  %s309_s3 = inlined_call_operand.hbm [shape: f32[8,16], index: 3, kind: output, shape index: {0}]   ;;  %s310_s4 = inlined_call_operand.hbm [shape: f32[8,16], index: 4, kind: output, shape index: {1}]  }
   0x1   :  { %v19_v0 = vld [vmem:[%s307_s1] sm:$0xff]  ;;  %v20_v1 = vld [vmem:[%s307_s1 + $0x8] sm:$0xff]  ;;  %v21_v2 = vld [vmem:[%s307_s1 + $0x10] sm:$0xff]  ;;  %167 = vmatprep.subr.bf16.mxu0 %v230_v3  ;;  %164 = vmatprep.mubr.msk.f32.mxu0 %vm231_vm0, %v232_v6 }
   0x2   :  { %v168_v4 = vpack.c.bf16 %v20_v1, %v19_v0  ;;  %v22_v5 = vld [vmem:[%s307_s1 + $0x18] sm:$0xff] }
   0x3   :  { %11 = vsyncpa [#allocation5], 0  ;;  %v171_v7 = vpack.c.bf16 %v22_v5, %v21_v2  ;;  %v18_v8 = vld [vmem:[%s306_s0] sm:$0xff]  ;;  %vm30_vm1 = vcmask 261120   ;;  %vm104_vm2 = vcmask 130048   ;;  %s233_s0 = smov [#allocation2]  }
   0x4   :  { %169 = vmatpush3.bf16.msra.mxu0 %v168_v4  ;;  %v149_v9 = vld [vmem:[%s308_s2] ss:$0 sm:$0xff]  ;;  %s127_s1 = sshll.u32 %s233_s0, 4  ;;  %s128_s1 = int_to_ptr.vmem [resolvable:$true] %s127_s1 }
   0x5   :  { %170 = vmatprep.subr.bf16.mxu0 %v230_v3  ;;  %s182_s2 = scalar_lea.vmem %s128_s1, 128  ;;  %p187_p1 = scmp.lt.s32.totalorder %s128_s1, %s128_s1 }
   0x6   :  { %p183_p0 = scmp.ne.s32.totalorder %s128_s1, %s182_s2  ;;  %p188_p2 = scmp.lt.s32.totalorder %s182_s2, %s182_s2 }
   0x8   :  { %172 = vmatpush3.bf16.msra.mxu0 %v171_v7  ;;  %p189_p3 = por %p188_p2, %p187_p1 }
   0xa   :  { %p190_p4 = pnand %p189_p3, %p183_p0 }
   0xb   :  { %165 = vmatmul.mubr.msk.f32.vlgmr.msra.gmra.mrb[0].mxu0 %vm30_vm1, %v18_v8 }
  0xde   :  { %v100_v10 = vpop.f32.mrb[0].mxu0 }
  0xdf   :  { %v101_v11 = vadd.f32 %v149_v9, %v100_v10  ;;  %v166_v12 = vpop.f32.mrb[1].mxu0 }
  0xe1   :  { %v105_v13 = vsel %vm104_vm2, %v101_v11, -inf  ;;  %120 = vst.msk [vmem:[#allocation2] sm:$0xff] %vm104_vm2, %v101_v11 }
  0xe2   :  { %106 = vmax.xlane.f32.xlu0 %v105_v13 }
 0x16f   :  { %v107_v14 = vpop.xlane.xlu0 %106 }
 0x170   :  { %v108_v15 = vsub.f32 %v101_v11, %v107_v14 }
 0x172   :  { %v109_v16 = vmul.f32 1.442695, %v108_v15 }
 0x174   :  { %178 = vpow2.f32 %v109_v16 }
 0x17e   :  { %v179_v17 = vpop.eup %178 }
 0x17f   :  { %v111_v18 = vsel %vm104_vm2, %v179_v17, 0.0 }
 0x180   :  { %112 = vadd.xlane.f32.xlu0 %v111_v18 }
 0x181   :  { %193 = shalt.err (!%p190_p4)
}
 0x182   :  { %s194_s29 = scalar_lea.hbm %s309_s3, 128 }
 0x183   :  { %p195_p5 = scmp.ne.s32.totalorder %s309_s3, %s194_s29  ;;  %p198_p6 = scmp.lt.u32.totalorder %s194_s29, %s309_s3 }
 0x185   :  { %p200_p7 = pnand %p198_p6, %p195_p5 }
 0x187   :  { %203 = shalt.err (!%p200_p7)
}
 0x188   :  { %130 = dma.vmem_to_hbm [thread:$0]  %s128_s1, 128, %s309_s3, [#allocation3]  }
 0x189   :  { %s234_s10 = smov [#allocation4]  }
 0x18a   :  { %s137_s11 = sshll.u32 %s234_s10, 4  ;;  %s138_s11 = int_to_ptr.vmem [resolvable:$true] %s137_s11 }
 0x18b   :  { %s204_s12 = scalar_lea.vmem %s138_s11, 128  ;;  %p209_p9 = scmp.lt.s32.totalorder %s138_s11, %s138_s11 }
 0x18c   :  { %p205_p8 = scmp.ne.s32.totalorder %s138_s11, %s204_s12  ;;  %p210_p10 = scmp.lt.s32.totalorder %s204_s12, %s204_s12 }
 0x18e   :  { %p211_p11 = por %p210_p10, %p209_p9 }
 0x190   :  { %p212_p12 = pnand %p211_p11, %p205_p8 }
 0x20d   :  { %v113_v19 = vpop.xlane.xlu0 %112 }
 0x20e   :  { %180 = vrcp.f32 %v113_v19 }
 0x218   :  { %v181_v20 = vpop.eup %180 }
 0x219   :  { %v115_v21 = vmul.f32 %v181_v20, %v113_v19 }
 0x21b   :  { %v116_v22 = vsub.f32 2.0, %v115_v21 }
 0x21d   :  { %v117_v23 = vmul.f32 %v181_v20, %v116_v22 }
 0x21f   :  { %v118_v24 = vmul.f32 %v179_v17, %v117_v23 }
 0x221   :  { %119 = vst.msk [vmem:[#allocation4] sm:$0xff] %vm104_vm2, %v118_v24 }
 0x222   :  { %215 = shalt.err (!%p212_p12)
}
 0x223   :  { %s216_s14 = scalar_lea.hbm %s310_s4, 128 }
 0x224   :  { %p217_p13 = scmp.ne.s32.totalorder %s310_s4, %s216_s14  ;;  %p220_p0 = scmp.lt.u32.totalorder %s216_s14, %s310_s4 }
 0x226   :  { %p222_p1 = pnand %p220_p0, %p217_p13 }
 0x228   :  { %225 = shalt.err (!%p222_p1)
}
 0x229   :  { %140 = dma.vmem_to_hbm [thread:$0]  %s138_s11, 128, %s310_s4, [#allocation5]  }
 0x22a   :  { %226 = dma.done.wait [#allocation3], 128  }
 0x22b   :  { %227 = vsyncadd [#allocation3], 4294967168 }
 0x22c   :  { %228 = dma.done.wait [#allocation5], 128  }
 0x22d   :  { %229 = vsyncadd [#allocation5], 4294967168 }
 0x22e   :  { %147 = vsyncpa [#allocation3], 1 }
 0x22f   :  { %148 = vsyncpa [#allocation5], 1 }

</bundles_post_ra>
